<compile_context>
chip_gen: v5e
topology: v5e:2x2
jax: 0.10.0
libtpu: 0.0.40
codegen_flags: <defaults>
</compile_context>

<pallas_src>
import jax
import jax.numpy as jnp
import numpy as np
from jax.experimental import pallas as pl
from jax.experimental.pallas import tpu as pltpu

_TILE_V = 2048  # vocab tile for streaming the fc_out weight


def _round_up(x, m):
    return (x + m - 1) // m * m


def decoder_kernel(emb_ref, hid_ref, enc_ref,
                   attn_wh_ref, attn_we_ref, attn_b_ref, v_ref,
                   w_ih_e_ref, w_ih_w_ref, b_ih_ref, w_hh_ref, b_hh_ref,
                   fc_wh_ref, fc_ww_ref, fc_we_ref, fc_b_ref,
                   pred_ref, hid_out_ref,
                   fh_scr, fw_scr, fe_scr):
    TB, S, H = enc_ref.shape

    # ---- attention + GRU: once per batch tile (v == 0); results carried in scratch ----
    @pl.when(pl.program_id(1) == 0)
    def _attention_and_gru():
        emb = emb_ref[...]                                  # [TB, H]   f32 (dropout = identity, eval mode)
        hid = hid_ref[...]                                  # [TB, H]   f32
        enc = enc_ref[...]                                  # [TB, S, H] bf16
        emb16 = emb.astype(jnp.bfloat16)
        hid16 = hid.astype(jnp.bfloat16)

        # energy = tanh(hid@Wh + enc@We + b); scores laid out [TB, S] (softmax on lanes)
        hid_term = jnp.dot(hid16, attn_wh_ref[...],
                           preferred_element_type=jnp.float32)                    # [TB, H]
        enc_term = jnp.dot(enc.reshape(TB * S, H), attn_we_ref[...],
                           preferred_element_type=jnp.float32).reshape(TB, S, H)  # [TB, S, H]
        energy = jnp.tanh(enc_term + hid_term[:, None, :] + attn_b_ref[...])      # [TB, S, H]
        scores = jnp.sum(energy * v_ref[...], axis=-1)                            # [TB, S]
        m = jnp.max(scores, axis=-1, keepdims=True)
        e = jnp.exp(scores - m)
        inv = pl.reciprocal(jnp.sum(e, axis=-1, keepdims=True), approx=True)
        a = e * inv                                                                # [TB, S]

        # context vector on the VPU (M=1 batched matmul would waste the MXU slot)
        weighted = jnp.sum(a[:, :, None] * enc, axis=1)                            # [TB, H] f32
        w16 = weighted.astype(jnp.bfloat16)

        # ---- GRU cell, single step, PyTorch gate order (r, z, n); split-segment dots ----
        gi = (jnp.dot(emb16, w_ih_e_ref[...], preferred_element_type=jnp.float32)
              + jnp.dot(w16, w_ih_w_ref[...], preferred_element_type=jnp.float32)
              + b_ih_ref[...])                                                     # [TB, 3H]
        gh = jnp.dot(hid16, w_hh_ref[...],
                     preferred_element_type=jnp.float32) + b_hh_ref[...]           # [TB, 3H]
        r = jax.nn.sigmoid(gi[:, 0:H] + gh[:, 0:H])
        z = jax.nn.sigmoid(gi[:, H:2 * H] + gh[:, H:2 * H])
        n = jnp.tanh(gi[:, 2 * H:3 * H] + r * gh[:, 2 * H:3 * H])
        h_new = (1.0 - z) * n + z * hid                                            # [TB, H]

        hid_out_ref[...] = h_new                    # resident across the vocab axis
        fh_scr[...] = jnp.tanh(h_new).astype(jnp.bfloat16)
        fw_scr[...] = jnp.tanh(weighted).astype(jnp.bfloat16)
        fe_scr[...] = jnp.tanh(emb).astype(jnp.bfloat16)

    # ---- fc_out for this vocab tile: pred = tanh(cat(out, weighted, emb)) @ W + b ----
    pred = (jnp.dot(fh_scr[...], fc_wh_ref[...], preferred_element_type=jnp.float32)
            + jnp.dot(fw_scr[...], fc_ww_ref[...], preferred_element_type=jnp.float32)
            + jnp.dot(fe_scr[...], fc_we_ref[...], preferred_element_type=jnp.float32)
            + fc_b_ref[...])                                                        # [TB, TILE_V]
    pred_ref[...] = pred


def init_params(key, vocab_size, hidden_dim):
    """Deterministic synthetic parameters, PyTorch storage layout ([out, in])."""
    H, V = hidden_dim, vocab_size
    ks = jax.random.split(key, 10)
    u = lambda k, shape, s: jax.random.uniform(k, shape, jnp.float32, -s, s)
    return {
        "emb":    u(ks[0], (V, H), 0.1),
        "attn_w": u(ks[1], (H, 2 * H), (2 * H) ** -0.5),
        "attn_b": u(ks[2], (H,), (2 * H) ** -0.5),
        "v_w":    u(ks[3], (1, H), H ** -0.5),
        "w_ih":   u(ks[4], (3 * H, 2 * H), H ** -0.5),
        "w_hh":   u(ks[5], (3 * H, H), H ** -0.5),
        "b_ih":   u(ks[6], (3 * H,), H ** -0.5),
        "b_hh":   u(ks[7], (3 * H,), H ** -0.5),
        "fc_w":   u(ks[8], (V, 3 * H), (3 * H) ** -0.5),
        "fc_b":   u(ks[9], (V,), (3 * H) ** -0.5),
    }


def prepare_weights(params, tile_v=_TILE_V):
    """One-time re-layout: [in, out] transposes, per-segment splits (no in-kernel
    concat), bf16 matmul weights, vocab padding for the fc_out streaming axis."""
    H = params["w_hh"].shape[1]
    V = params["fc_w"].shape[0]
    v_pad = _round_up(V, 128) if V <= tile_v else _round_up(V, tile_v)
    bf16 = jnp.bfloat16

    fc_wT = params["fc_w"].T                      # [3H, V]
    pad_v = lambda w: jnp.pad(w, ((0, 0), (0, v_pad - V))) if v_pad != V else w

    return {
        "emb":     params["emb"],                                    # [V, H]  f32 (gather table)
        "attn_wh": params["attn_w"][:, :H].T.astype(bf16),           # [H, H]  hidden part
        "attn_we": params["attn_w"][:, H:].T.astype(bf16),           # [H, H]  encoder part
        "attn_b":  params["attn_b"][None, :],                        # [1, H]  f32
        "v":       params["v_w"],                                    # [1, H]  f32
        "w_ih_e":  params["w_ih"][:, :H].T.astype(bf16),             # [H, 3H] (embedded rows)
        "w_ih_w":  params["w_ih"][:, H:].T.astype(bf16),             # [H, 3H] (weighted rows)
        "b_ih":    params["b_ih"][None, :],                          # [1, 3H] f32
        "w_hh":    params["w_hh"].T.astype(bf16),                    # [H, 3H]
        "b_hh":    params["b_hh"][None, :],                          # [1, 3H] f32
        "fc_wh":   pad_v(fc_wT[0 * H:1 * H]).astype(bf16),           # [H, Vp] (output rows)
        "fc_ww":   pad_v(fc_wT[1 * H:2 * H]).astype(bf16),           # [H, Vp] (weighted rows)
        "fc_we":   pad_v(fc_wT[2 * H:3 * H]).astype(bf16),           # [H, Vp] (embedded rows)
        "fc_b":    jnp.pad(params["fc_b"], (0, v_pad - V))[None, :], # [1, Vp] f32
    }


def _choose_tile_b(B, S, H):
    """Batch tile: >=2 tiles (megacore) once B is big enough; capped so the
    [tile_b, S, H] f32 attention intermediates stay modest."""
    if B <= 15:
        return B
    cap = max(8, ((8 << 20) // (4 * S * H)) // 8 * 8)
    tile = 128 if B >= 256 else min(128, _round_up((B + 1) // 2, 8))
    return max(8, min(tile, cap))


def _vmem_limit_bytes(tile_b, S, H, tile_v):
    f32, bf16 = 4, 2
    enc_blk = tile_b * S * H * bf16
    io_blk = tile_b * H * f32 * 2 + tile_b * (tile_v + H) * f32
    fc_blk = 3 * H * tile_v * bf16 + tile_v * f32
    fixed_w = (2 * H * H + 3 * H * 3 * H) * bf16 + 8 * H * f32
    interm = 2 * tile_b * S * H * f32 + 6 * tile_b * 3 * H * f32
    scratch = 3 * tile_b * H * bf16
    total = 2 * (enc_blk + io_blk + fc_blk + fixed_w) + interm + scratch
    return int(min(max(2 * total, 32 << 20), 64 << 20))


@jax.jit
def decoder_forward(weights, input_ids, hidden, encoder_outputs):
    B, S, H = encoder_outputs.shape
    V = weights["emb"].shape[0]
    V_pad = weights["fc_b"].shape[-1]

    # Glue: embedding gather + dropout (identity in eval / inference mode).
    # TODO(synk): training-mode dropout RNG not reproduced (inference semantics only).
    embedded = weights["emb"][input_ids]                 # [B, H] f32

    tile_b = _choose_tile_b(B, S, H)
    B_pad = _round_up(B, tile_b)
    tile_v = V_pad if V_pad <= _TILE_V else _TILE_V
    assert V_pad % tile_v == 0
    grid = (B_pad // tile_b, V_pad // tile_v)

    enc = encoder_outputs.astype(jnp.bfloat16)           # halve the largest activation DMA
    hidden_in = hidden
    if B_pad != B:                                       # pad irregular B instead of a VMEM cliff
        dp = B_pad - B
        embedded = jnp.pad(embedded, ((0, dp), (0, 0)))
        hidden_in = jnp.pad(hidden_in, ((0, dp), (0, 0)))
        enc = jnp.pad(enc, ((0, dp), (0, 0), (0, 0)))

    def w_spec(w):
        nd = w.ndim
        return pl.BlockSpec(w.shape, lambda b, v, _nd=nd: (0,) * _nd)

    pred, h_new = pl.pallas_call(
        decoder_kernel,
        out_shape=(jax.ShapeDtypeStruct((B_pad, V_pad), jnp.float32),
                   jax.ShapeDtypeStruct((B_pad, H), jnp.float32)),
        grid=grid,
        in_specs=[
            pl.BlockSpec((tile_b, H), lambda b, v: (b, 0)),        # embedded
            pl.BlockSpec((tile_b, H), lambda b, v: (b, 0)),        # hidden
            pl.BlockSpec((tile_b, S, H), lambda b, v: (b, 0, 0)),  # encoder outputs
            w_spec(weights["attn_wh"]), w_spec(weights["attn_we"]),
            w_spec(weights["attn_b"]), w_spec(weights["v"]),
            w_spec(weights["w_ih_e"]), w_spec(weights["w_ih_w"]),
            w_spec(weights["b_ih"]),
            w_spec(weights["w_hh"]), w_spec(weights["b_hh"]),
            pl.BlockSpec((H, tile_v), lambda b, v: (0, v)),        # fc_wh tile
            pl.BlockSpec((H, tile_v), lambda b, v: (0, v)),        # fc_ww tile
            pl.BlockSpec((H, tile_v), lambda b, v: (0, v)),        # fc_we tile
            pl.BlockSpec((1, tile_v), lambda b, v: (0, v)),        # fc_b tile
        ],
        out_specs=(pl.BlockSpec((tile_b, tile_v), lambda b, v: (b, v)),
                   pl.BlockSpec((tile_b, H), lambda b, v: (b, 0))),
        scratch_shapes=[pltpu.VMEM((tile_b, H), jnp.bfloat16)] * 3,
        compiler_params=pltpu.CompilerParams(
            dimension_semantics=("parallel", "arbitrary"),
            vmem_limit_bytes=_vmem_limit_bytes(tile_b, S, H, tile_v)),
    )(embedded, hidden_in, enc,
      weights["attn_wh"], weights["attn_we"], weights["attn_b"], weights["v"],
      weights["w_ih_e"], weights["w_ih_w"], weights["b_ih"],
      weights["w_hh"], weights["b_hh"],
      weights["fc_wh"], weights["fc_ww"], weights["fc_we"], weights["fc_b"])

    return pred[:B, :V], h_new[:B]


def decoder_ref(params, input_ids, hidden, encoder_outputs):
    """Pure-JAX f32 mirror of the PyTorch forward (for correctness check)."""
    B, S, H = encoder_outputs.shape
    embedded = params["emb"][input_ids][:, None, :]                  # [B,1,H]
    h_rep = jnp.repeat(hidden[:, None, :], S, axis=1)                # [B,S,H]
    cat = jnp.concatenate([h_rep, encoder_outputs], axis=2)          # [B,S,2H]
    energy = jnp.tanh(cat @ params["attn_w"].T + params["attn_b"])   # [B,S,H]
    attn = jnp.squeeze(energy @ params["v_w"].T, axis=2)             # [B,S]
    a = jax.nn.softmax(attn, axis=1)[:, None, :]                     # [B,1,S]
    weighted = a @ encoder_outputs                                   # [B,1,H]
    rnn_in = jnp.concatenate([embedded, weighted], axis=2)[:, 0, :]  # [B,2H]
    gi = rnn_in @ params["w_ih"].T + params["b_ih"]
    gh = hidden @ params["w_hh"].T + params["b_hh"]
    r = jax.nn.sigmoid(gi[:, :H] + gh[:, :H])
    z = jax.nn.sigmoid(gi[:, H:2 * H] + gh[:, H:2 * H])
    n = jnp.tanh(gi[:, 2 * H:] + r * gh[:, 2 * H:])
    h_new = (1.0 - z) * n + z * hidden                               # [B,H]
    cat2 = jnp.concatenate([h_new[:, None, :], weighted, embedded], axis=2)
    pred = jnp.tanh(cat2) @ params["fc_w"].T + params["fc_b"]        # [B,1,V]
    return pred[:, 0, :], h_new


if __name__ == "__main__":
    B, S, H, V = 2, 8, 32, 48

    key = jax.random.PRNGKey(0)
    k_p, k_id, k_h, k_e = jax.random.split(key, 4)
    params = init_params(k_p, vocab_size=V, hidden_dim=H)
    weights = prepare_weights(params)   # layout / bf16 / split prep done once, off the critical path

    input_ids = jax.random.randint(k_id, (B,), 0, V, dtype=jnp.int32)
    hidden = jax.random.normal(k_h, (B, H), dtype=jnp.float32)
    encoder_outputs = jax.random.normal(k_e, (B, S, H), dtype=jnp.float32)

    pred, h_new = decoder_forward(weights, input_ids, hidden, encoder_outputs)
    jax.block_until_ready((pred, h_new))

    pred_ref, h_ref = decoder_ref(params, input_ids, hidden, encoder_outputs)
    # bf16 matmul weights/activations (f32 accumulation) -> relaxed tolerance vs. f32 reference
    np.testing.assert_allclose(np.asarray(pred), np.asarray(pred_ref), rtol=2e-2, atol=2e-2)
    np.testing.assert_allclose(np.asarray(h_new), np.asarray(h_ref), rtol=2e-2, atol=2e-2)

    assert pred.shape == (B, V) and h_new.shape == (B, H)
    print("KERNEL_OK")
</pallas_src>

<mosaic_0001>
module attributes {stable_mosaic.version = 11 : i64} {
  func.func @decoder_kernel(%arg0: i32, %arg1: i32, %arg2: memref<2x32xf32, #tpu.memory_space<vmem>>, %arg3: memref<2x32xf32, #tpu.memory_space<vmem>>, %arg4: memref<2x8x32xbf16, #tpu.memory_space<vmem>>, %arg5: memref<32x32xbf16, #tpu.memory_space<vmem>>, %arg6: memref<32x32xbf16, #tpu.memory_space<vmem>>, %arg7: memref<1x32xf32, #tpu.memory_space<vmem>>, %arg8: memref<1x32xf32, #tpu.memory_space<vmem>>, %arg9: memref<32x96xbf16, #tpu.memory_space<vmem>>, %arg10: memref<32x96xbf16, #tpu.memory_space<vmem>>, %arg11: memref<1x96xf32, #tpu.memory_space<vmem>>, %arg12: memref<32x96xbf16, #tpu.memory_space<vmem>>, %arg13: memref<1x96xf32, #tpu.memory_space<vmem>>, %arg14: memref<32x128xbf16, #tpu.memory_space<vmem>>, %arg15: memref<32x128xbf16, #tpu.memory_space<vmem>>, %arg16: memref<32x128xbf16, #tpu.memory_space<vmem>>, %arg17: memref<1x128xf32, #tpu.memory_space<vmem>>, %arg18: memref<2x128xf32, #tpu.memory_space<vmem>>, %arg19: memref<2x32xf32, #tpu.memory_space<vmem>>, %arg20: memref<2x32xbf16, #tpu.memory_space<vmem>>, %arg21: memref<2x32xbf16, #tpu.memory_space<vmem>>, %arg22: memref<2x32xbf16, #tpu.memory_space<vmem>>) attributes {dimension_semantics = [#tpu.dimension_semantics<parallel>, #tpu.dimension_semantics<arbitrary>], iteration_bounds = array<i64: 1, 1>, scalar_prefetch = 0 : i64, scratch_operands = 3 : i64, tpu.core_type = #tpu.core_type<tc>, window_params = [{transform_indices = @transform_0, window_bounds = array<i64: 2, 32>}, {transform_indices = @transform_1, window_bounds = array<i64: 2, 32>}, {transform_indices = @transform_2, window_bounds = array<i64: 2, 8, 32>}, {pipeline_mode = #tpu.pipeline_mode<synchronous>, transform_indices = @transform_3, window_bounds = array<i64: 32, 32>}, {pipeline_mode = #tpu.pipeline_mode<synchronous>, transform_indices = @transform_4, window_bounds = array<i64: 32, 32>}, {pipeline_mode = #tpu.pipeline_mode<synchronous>, transform_indices = @transform_5, window_bounds = array<i64: 1, 32>}, {pipeline_mode = #tpu.pipeline_mode<synchronous>, transform_indices = @transform_6, window_bounds = array<i64: 1, 32>}, {pipeline_mode = #tpu.pipeline_mode<synchronous>, transform_indices = @transform_7, window_bounds = array<i64: 32, 96>}, {pipeline_mode = #tpu.pipeline_mode<synchronous>, transform_indices = @transform_8, window_bounds = array<i64: 32, 96>}, {pipeline_mode = #tpu.pipeline_mode<synchronous>, transform_indices = @transform_9, window_bounds = array<i64: 1, 96>}, {pipeline_mode = #tpu.pipeline_mode<synchronous>, transform_indices = @transform_10, window_bounds = array<i64: 32, 96>}, {pipeline_mode = #tpu.pipeline_mode<synchronous>, transform_indices = @transform_11, window_bounds = array<i64: 1, 96>}, {transform_indices = @transform_12, window_bounds = array<i64: 32, 128>}, {transform_indices = @transform_13, window_bounds = array<i64: 32, 128>}, {transform_indices = @transform_14, window_bounds = array<i64: 32, 128>}, {transform_indices = @transform_15, window_bounds = array<i64: 1, 128>}, {transform_indices = @transform_16, window_bounds = array<i64: 2, 128>}, {transform_indices = @transform_17, window_bounds = array<i64: 2, 32>}]} {
    %c0_i32 = arith.constant 0 : i32
    %0 = arith.cmpi eq, %arg1, %c0_i32 : i32
    %1 = arith.extui %0 : i1 to i32
    %c0_i32_0 = arith.constant 0 : i32
    %2 = arith.cmpi ne, %1, %c0_i32_0 : i32
    scf.if %2 {
      %c0_18 = arith.constant 0 : index
      %c0_19 = arith.constant 0 : index
      %18 = vector.load %arg2[%c0_18, %c0_19] : memref<2x32xf32, #tpu.memory_space<vmem>>, vector<2x32xf32>
      %c0_20 = arith.constant 0 : index
      %c0_21 = arith.constant 0 : index
      %19 = vector.load %arg3[%c0_20, %c0_21] : memref<2x32xf32, #tpu.memory_space<vmem>>, vector<2x32xf32>
      %c0_22 = arith.constant 0 : index
      %c0_23 = arith.constant 0 : index
      %c0_24 = arith.constant 0 : index
      %20 = vector.load %arg4[%c0_22, %c0_23, %c0_24] : memref<2x8x32xbf16, #tpu.memory_space<vmem>>, vector<2x8x32xbf16>
      %21 = arith.truncf %18 : vector<2x32xf32> to vector<2x32xbf16>
      %22 = arith.truncf %19 : vector<2x32xf32> to vector<2x32xbf16>
      %c0_25 = arith.constant 0 : index
      %c0_26 = arith.constant 0 : index
      %23 = vector.load %arg5[%c0_25, %c0_26] : memref<32x32xbf16, #tpu.memory_space<vmem>>, vector<32x32xbf16>
      %cst_27 = arith.constant dense<0.000000e+00> : vector<2x32xf32>
      %24 = tpu.matmul %22, %23, %cst_27 {dimension_numbers = #tpu.dot_dimension_numbers<[1], [0], [0], [1], [0, 0, 1, 1], [], []>} : vector<2x32xbf16>, vector<32x32xbf16>, vector<2x32xf32> -> vector<2x32xf32>
      %25 = vector.shape_cast %20 : vector<2x8x32xbf16> to vector<16x32xbf16>
      %c0_28 = arith.constant 0 : index
      %c0_29 = arith.constant 0 : index
      %26 = vector.load %arg6[%c0_28, %c0_29] : memref<32x32xbf16, #tpu.memory_space<vmem>>, vector<32x32xbf16>
      %cst_30 = arith.constant dense<0.000000e+00> : vector<16x32xf32>
      %27 = tpu.matmul %25, %26, %cst_30 {dimension_numbers = #tpu.dot_dimension_numbers<[1], [0], [0], [1], [0, 0, 1, 1], [], []>} : vector<16x32xbf16>, vector<32x32xbf16>, vector<16x32xf32> -> vector<16x32xf32>
      %28 = vector.shape_cast %27 : vector<16x32xf32> to vector<2x8x32xf32>
      %29 = vector.shape_cast %24 : vector<2x32xf32> to vector<2x1x32xf32>
      %30 = vector.broadcast %29 : vector<2x1x32xf32> to vector<2x8x32xf32>
      %31 = arith.addf %28, %30 : vector<2x8x32xf32>
      %c0_31 = arith.constant 0 : index
      %c0_32 = arith.constant 0 : index
      %32 = vector.load %arg7[%c0_31, %c0_32] : memref<1x32xf32, #tpu.memory_space<vmem>>, vector<1x32xf32>
      %33 = vector.shape_cast %32 : vector<1x32xf32> to vector<1x1x32xf32>
      %34 = vector.broadcast %33 : vector<1x1x32xf32> to vector<2x8x32xf32>
      %35 = arith.addf %31, %34 : vector<2x8x32xf32>
      %36 = math.tanh %35 : vector<2x8x32xf32>
      %c0_33 = arith.constant 0 : index
      %c0_34 = arith.constant 0 : index
      %37 = vector.load %arg8[%c0_33, %c0_34] : memref<1x32xf32, #tpu.memory_space<vmem>>, vector<1x32xf32>
      %38 = vector.shape_cast %37 : vector<1x32xf32> to vector<1x1x32xf32>
      %39 = vector.broadcast %38 : vector<1x1x32xf32> to vector<2x8x32xf32>
      %40 = arith.mulf %36, %39 : vector<2x8x32xf32>
      %cst_35 = arith.constant dense<0.000000e+00> : vector<2x8xf32>
      %41 = vector.multi_reduction <add>, %40, %cst_35 [2] : vector<2x8x32xf32> to vector<2x8xf32>
      %cst_36 = arith.constant dense<0xFF800000> : vector<2xf32>
      %42 = vector.multi_reduction <maximumf>, %41, %cst_36 [1] : vector<2x8xf32> to vector<2xf32>
      %43 = vector.shape_cast %42 : vector<2xf32> to vector<2x1xf32>
      %44 = vector.broadcast %43 : vector<2x1xf32> to vector<2x8xf32>
      %45 = arith.subf %41, %44 : vector<2x8xf32>
      %46 = math.exp %45 : vector<2x8xf32>
      %cst_37 = arith.constant dense<0.000000e+00> : vector<2xf32>
      %47 = vector.multi_reduction <add>, %46, %cst_37 [1] : vector<2x8xf32> to vector<2xf32>
      %48 = vector.shape_cast %47 : vector<2xf32> to vector<2x1xf32>
      %49 = tpu.reciprocal %48 {approx = true} : vector<2x1xf32> -> vector<2x1xf32>
      %50 = vector.broadcast %49 : vector<2x1xf32> to vector<2x8xf32>
      %51 = arith.mulf %46, %50 : vector<2x8xf32>
      %52 = vector.shape_cast %51 : vector<2x8xf32> to vector<2x8x1xf32>
      %53 = arith.extf %20 : vector<2x8x32xbf16> to vector<2x8x32xf32>
      %54 = vector.broadcast %52 : vector<2x8x1xf32> to vector<2x8x32xf32>
      %55 = arith.mulf %54, %53 : vector<2x8x32xf32>
      %cst_38 = arith.constant dense<0.000000e+00> : vector<2x32xf32>
      %56 = vector.multi_reduction <add>, %55, %cst_38 [1] : vector<2x8x32xf32> to vector<2x32xf32>
      %57 = arith.truncf %56 : vector<2x32xf32> to vector<2x32xbf16>
      %c0_39 = arith.constant 0 : index
      %c0_40 = arith.constant 0 : index
      %58 = vector.load %arg9[%c0_39, %c0_40] : memref<32x96xbf16, #tpu.memory_space<vmem>>, vector<32x96xbf16>
      %cst_41 = arith.constant dense<0.000000e+00> : vector<2x96xf32>
      %59 = tpu.matmul %21, %58, %cst_41 {dimension_numbers = #tpu.dot_dimension_numbers<[1], [0], [0], [1], [0, 0, 1, 1], [], []>} : vector<2x32xbf16>, vector<32x96xbf16>, vector<2x96xf32> -> vector<2x96xf32>
      %c0_42 = arith.constant 0 : index
      %c0_43 = arith.constant 0 : index
      %60 = vector.load %arg10[%c0_42, %c0_43] : memref<32x96xbf16, #tpu.memory_space<vmem>>, vector<32x96xbf16>
      %cst_44 = arith.constant dense<0.000000e+00> : vector<2x96xf32>
      %61 = tpu.matmul %57, %60, %cst_44 {dimension_numbers = #tpu.dot_dimension_numbers<[1], [0], [0], [1], [0, 0, 1, 1], [], []>} : vector<2x32xbf16>, vector<32x96xbf16>, vector<2x96xf32> -> vector<2x96xf32>
      %62 = arith.addf %59, %61 : vector<2x96xf32>
      %c0_45 = arith.constant 0 : index
      %c0_46 = arith.constant 0 : index
      %63 = vector.load %arg11[%c0_45, %c0_46] : memref<1x96xf32, #tpu.memory_space<vmem>>, vector<1x96xf32>
      %64 = vector.broadcast %63 : vector<1x96xf32> to vector<2x96xf32>
      %65 = arith.addf %62, %64 : vector<2x96xf32>
      %c0_47 = arith.constant 0 : index
      %c0_48 = arith.constant 0 : index
      %66 = vector.load %arg12[%c0_47, %c0_48] : memref<32x96xbf16, #tpu.memory_space<vmem>>, vector<32x96xbf16>
      %cst_49 = arith.constant dense<0.000000e+00> : vector<2x96xf32>
      %67 = tpu.matmul %22, %66, %cst_49 {dimension_numbers = #tpu.dot_dimension_numbers<[1], [0], [0], [1], [0, 0, 1, 1], [], []>} : vector<2x32xbf16>, vector<32x96xbf16>, vector<2x96xf32> -> vector<2x96xf32>
      %c0_50 = arith.constant 0 : index
      %c0_51 = arith.constant 0 : index
      %68 = vector.load %arg13[%c0_50, %c0_51] : memref<1x96xf32, #tpu.memory_space<vmem>>, vector<1x96xf32>
      %69 = vector.broadcast %68 : vector<1x96xf32> to vector<2x96xf32>
      %70 = arith.addf %67, %69 : vector<2x96xf32>
      %71 = vector.extract_strided_slice %65 {offsets = [0, 0], sizes = [2, 32], strides = [1, 1]} : vector<2x96xf32> to vector<2x32xf32>
      %72 = vector.extract_strided_slice %70 {offsets = [0, 0], sizes = [2, 32], strides = [1, 1]} : vector<2x96xf32> to vector<2x32xf32>
      %73 = arith.addf %71, %72 : vector<2x32xf32>
      %74 = arith.negf %73 : vector<2x32xf32>
      %75 = math.exp %74 : vector<2x32xf32>
      %cst_52 = arith.constant 1.000000e+00 : f32
      %76 = vector.broadcast %cst_52 : f32 to vector<2x32xf32>
      %77 = arith.addf %76, %75 : vector<2x32xf32>
      %78 = arith.divf %76, %77 : vector<2x32xf32>
      %79 = vector.extract_strided_slice %65 {offsets = [0, 32], sizes = [2, 32], strides = [1, 1]} : vector<2x96xf32> to vector<2x32xf32>
      %80 = vector.extract_strided_slice %70 {offsets = [0, 32], sizes = [2, 32], strides = [1, 1]} : vector<2x96xf32> to vector<2x32xf32>
      %81 = arith.addf %79, %80 : vector<2x32xf32>
      %82 = arith.negf %81 : vector<2x32xf32>
      %83 = math.exp %82 : vector<2x32xf32>
      %cst_53 = arith.constant 1.000000e+00 : f32
      %84 = vector.broadcast %cst_53 : f32 to vector<2x32xf32>
      %85 = arith.addf %84, %83 : vector<2x32xf32>
      %86 = arith.divf %84, %85 : vector<2x32xf32>
      %87 = vector.extract_strided_slice %65 {offsets = [0, 64], sizes = [2, 32], strides = [1, 1]} : vector<2x96xf32> to vector<2x32xf32>
      %88 = vector.extract_strided_slice %70 {offsets = [0, 64], sizes = [2, 32], strides = [1, 1]} : vector<2x96xf32> to vector<2x32xf32>
      %89 = arith.mulf %78, %88 : vector<2x32xf32>
      %90 = arith.addf %87, %89 : vector<2x32xf32>
      %91 = math.tanh %90 : vector<2x32xf32>
      %cst_54 = arith.constant 1.000000e+00 : f32
      %92 = vector.broadcast %cst_54 : f32 to vector<2x32xf32>
      %93 = arith.subf %92, %86 : vector<2x32xf32>
      %94 = arith.mulf %93, %91 : vector<2x32xf32>
      %95 = arith.mulf %86, %19 : vector<2x32xf32>
      %96 = arith.addf %94, %95 : vector<2x32xf32>
      %c0_55 = arith.constant 0 : index
      %c0_56 = arith.constant 0 : index
      %97 = vector.load %arg19[%c0_55, %c0_56] : memref<2x32xf32, #tpu.memory_space<vmem>>, vector<2x32xf32>
      tpu.vector_store %arg19[%c0_55, %c0_56], %96 {strides = array<i32>} : memref<2x32xf32, #tpu.memory_space<vmem>>, vector<2x32xf32>,
      %98 = math.tanh %96 : vector<2x32xf32>
      %99 = arith.truncf %98 : vector<2x32xf32> to vector<2x32xbf16>
      %c0_57 = arith.constant 0 : index
      %c0_58 = arith.constant 0 : index
      %100 = vector.load %arg20[%c0_57, %c0_58] : memref<2x32xbf16, #tpu.memory_space<vmem>>, vector<2x32xbf16>
      tpu.vector_store %arg20[%c0_57, %c0_58], %99 {strides = array<i32>} : memref<2x32xbf16, #tpu.memory_space<vmem>>, vector<2x32xbf16>,
      %101 = math.tanh %56 : vector<2x32xf32>
      %102 = arith.truncf %101 : vector<2x32xf32> to vector<2x32xbf16>
      %c0_59 = arith.constant 0 : index
      %c0_60 = arith.constant 0 : index
      %103 = vector.load %arg21[%c0_59, %c0_60] : memref<2x32xbf16, #tpu.memory_space<vmem>>, vector<2x32xbf16>
      tpu.vector_store %arg21[%c0_59, %c0_60], %102 {strides = array<i32>} : memref<2x32xbf16, #tpu.memory_space<vmem>>, vector<2x32xbf16>,
      %104 = math.tanh %18 : vector<2x32xf32>
      %105 = arith.truncf %104 : vector<2x32xf32> to vector<2x32xbf16>
      %c0_61 = arith.constant 0 : index
      %c0_62 = arith.constant 0 : index
      %106 = vector.load %arg22[%c0_61, %c0_62] : memref<2x32xbf16, #tpu.memory_space<vmem>>, vector<2x32xbf16>
      tpu.vector_store %arg22[%c0_61, %c0_62], %105 {strides = array<i32>} : memref<2x32xbf16, #tpu.memory_space<vmem>>, vector<2x32xbf16>,
    } else {
    }
    %c0 = arith.constant 0 : index
    %c0_1 = arith.constant 0 : index
    %3 = vector.load %arg20[%c0, %c0_1] : memref<2x32xbf16, #tpu.memory_space<vmem>>, vector<2x32xbf16>
    %c0_2 = arith.constant 0 : index
    %c0_3 = arith.constant 0 : index
    %4 = vector.load %arg14[%c0_2, %c0_3] : memref<32x128xbf16, #tpu.memory_space<vmem>>, vector<32x128xbf16>
    %cst = arith.constant dense<0.000000e+00> : vector<2x128xf32>
    %5 = tpu.matmul %3, %4, %cst {dimension_numbers = #tpu.dot_dimension_numbers<[1], [0], [0], [1], [0, 0, 1, 1], [], []>} : vector<2x32xbf16>, vector<32x128xbf16>, vector<2x128xf32> -> vector<2x128xf32>
    %c0_4 = arith.constant 0 : index
    %c0_5 = arith.constant 0 : index
    %6 = vector.load %arg21[%c0_4, %c0_5] : memref<2x32xbf16, #tpu.memory_space<vmem>>, vector<2x32xbf16>
    %c0_6 = arith.constant 0 : index
    %c0_7 = arith.constant 0 : index
    %7 = vector.load %arg15[%c0_6, %c0_7] : memref<32x128xbf16, #tpu.memory_space<vmem>>, vector<32x128xbf16>
    %cst_8 = arith.constant dense<0.000000e+00> : vector<2x128xf32>
    %8 = tpu.matmul %6, %7, %cst_8 {dimension_numbers = #tpu.dot_dimension_numbers<[1], [0], [0], [1], [0, 0, 1, 1], [], []>} : vector<2x32xbf16>, vector<32x128xbf16>, vector<2x128xf32> -> vector<2x128xf32>
    %9 = arith.addf %5, %8 : vector<2x128xf32>
    %c0_9 = arith.constant 0 : index
    %c0_10 = arith.constant 0 : index
    %10 = vector.load %arg22[%c0_9, %c0_10] : memref<2x32xbf16, #tpu.memory_space<vmem>>, vector<2x32xbf16>
    %c0_11 = arith.constant 0 : index
    %c0_12 = arith.constant 0 : index
    %11 = vector.load %arg16[%c0_11, %c0_12] : memref<32x128xbf16, #tpu.memory_space<vmem>>, vector<32x128xbf16>
    %cst_13 = arith.constant dense<0.000000e+00> : vector<2x128xf32>
    %12 = tpu.matmul %10, %11, %cst_13 {dimension_numbers = #tpu.dot_dimension_numbers<[1], [0], [0], [1], [0, 0, 1, 1], [], []>} : vector<2x32xbf16>, vector<32x128xbf16>, vector<2x128xf32> -> vector<2x128xf32>
    %13 = arith.addf %9, %12 : vector<2x128xf32>
    %c0_14 = arith.constant 0 : index
    %c0_15 = arith.constant 0 : index
    %14 = vector.load %arg17[%c0_14, %c0_15] : memref<1x128xf32, #tpu.memory_space<vmem>>, vector<1x128xf32>
    %15 = vector.broadcast %14 : vector<1x128xf32> to vector<2x128xf32>
    %16 = arith.addf %13, %15 : vector<2x128xf32>
    %c0_16 = arith.constant 0 : index
    %c0_17 = arith.constant 0 : index
    %17 = vector.load %arg18[%c0_16, %c0_17] : memref<2x128xf32, #tpu.memory_space<vmem>>, vector<2x128xf32>
    tpu.vector_store %arg18[%c0_16, %c0_17], %16 {strides = array<i32>} : memref<2x128xf32, #tpu.memory_space<vmem>>, vector<2x128xf32>,
    return
  }
  func.func @transform_0(%arg0: i32, %arg1: i32) -> (i32, i32) {
    %c0_i32 = arith.constant 0 : i32
    %c0_i32_0 = arith.constant 0 : i32
    return %arg0, %c0_i32 : i32, i32
  }
  func.func @transform_1(%arg0: i32, %arg1: i32) -> (i32, i32) {
    %c0_i32 = arith.constant 0 : i32
    %c0_i32_0 = arith.constant 0 : i32
    return %arg0, %c0_i32 : i32, i32
  }
  func.func @transform_2(%arg0: i32, %arg1: i32) -> (i32, i32, i32) {
    %c0_i32 = arith.constant 0 : i32
    %c0_i32_0 = arith.constant 0 : i32
    %c0_i32_1 = arith.constant 0 : i32
    return %arg0, %c0_i32, %c0_i32_0 : i32, i32, i32
  }
  func.func @transform_3(%arg0: i32, %arg1: i32) -> (i32, i32) {
    %c0_i32 = arith.constant 0 : i32
    %c0_i32_0 = arith.constant 0 : i32
    %c0_i32_1 = arith.constant 0 : i32
    return %c0_i32, %c0_i32_0 : i32, i32
  }
  func.func @transform_4(%arg0: i32, %arg1: i32) -> (i32, i32) {
    %c0_i32 = arith.constant 0 : i32
    %c0_i32_0 = arith.constant 0 : i32
    %c0_i32_1 = arith.constant 0 : i32
    return %c0_i32, %c0_i32_0 : i32, i32
  }
  func.func @transform_5(%arg0: i32, %arg1: i32) -> (i32, i32) {
    %c0_i32 = arith.constant 0 : i32
    %c0_i32_0 = arith.constant 0 : i32
    %c0_i32_1 = arith.constant 0 : i32
    return %c0_i32, %c0_i32_0 : i32, i32
  }
  func.func @transform_6(%arg0: i32, %arg1: i32) -> (i32, i32) {
    %c0_i32 = arith.constant 0 : i32
    %c0_i32_0 = arith.constant 0 : i32
    %c0_i32_1 = arith.constant 0 : i32
    return %c0_i32, %c0_i32_0 : i32, i32
  }
  func.func @transform_7(%arg0: i32, %arg1: i32) -> (i32, i32) {
    %c0_i32 = arith.constant 0 : i32
    %c0_i32_0 = arith.constant 0 : i32
    %c0_i32_1 = arith.constant 0 : i32
    return %c0_i32, %c0_i32_0 : i32, i32
  }
  func.func @transform_8(%arg0: i32, %arg1: i32) -> (i32, i32) {
    %c0_i32 = arith.constant 0 : i32
    %c0_i32_0 = arith.constant 0 : i32
    %c0_i32_1 = arith.constant 0 : i32
    return %c0_i32, %c0_i32_0 : i32, i32
  }
  func.func @transform_9(%arg0: i32, %arg1: i32) -> (i32, i32) {
    %c0_i32 = arith.constant 0 : i32
    %c0_i32_0 = arith.constant 0 : i32
    %c0_i32_1 = arith.constant 0 : i32
    return %c0_i32, %c0_i32_0 : i32, i32
  }
  func.func @transform_10(%arg0: i32, %arg1: i32) -> (i32, i32) {
    %c0_i32 = arith.constant 0 : i32
    %c0_i32_0 = arith.constant 0 : i32
    %c0_i32_1 = arith.constant 0 : i32
    return %c0_i32, %c0_i32_0 : i32, i32
  }
  func.func @transform_11(%arg0: i32, %arg1: i32) -> (i32, i32) {
    %c0_i32 = arith.constant 0 : i32
    %c0_i32_0 = arith.constant 0 : i32
    %c0_i32_1 = arith.constant 0 : i32
    return %c0_i32, %c0_i32_0 : i32, i32
  }
  func.func @transform_12(%arg0: i32, %arg1: i32) -> (i32, i32) {
    %c0_i32 = arith.constant 0 : i32
    %c0_i32_0 = arith.constant 0 : i32
    return %c0_i32, %arg1 : i32, i32
  }
  func.func @transform_13(%arg0: i32, %arg1: i32) -> (i32, i32) {
    %c0_i32 = arith.constant 0 : i32
    %c0_i32_0 = arith.constant 0 : i32
    return %c0_i32, %arg1 : i32, i32
  }
  func.func @transform_14(%arg0: i32, %arg1: i32) -> (i32, i32) {
    %c0_i32 = arith.constant 0 : i32
    %c0_i32_0 = arith.constant 0 : i32
    return %c0_i32, %arg1 : i32, i32
  }
  func.func @transform_15(%arg0: i32, %arg1: i32) -> (i32, i32) {
    %c0_i32 = arith.constant 0 : i32
    %c0_i32_0 = arith.constant 0 : i32
    return %c0_i32, %arg1 : i32, i32
  }
  func.func @transform_16(%arg0: i32, %arg1: i32) -> (i32, i32) {
    %c0_i32 = arith.constant 0 : i32
    return %arg0, %arg1 : i32, i32
  }
  func.func @transform_17(%arg0: i32, %arg1: i32) -> (i32, i32) {
    %c0_i32 = arith.constant 0 : i32
    %c0_i32_0 = arith.constant 0 : i32
    return %arg0, %c0_i32 : i32, i32
  }
}

</mosaic_0001>

<bundles_post_ra>
// kernel: decoder_forward.1
= control target key start
LH: loop header
LB: loop body
LE: loop exit
PB: predicated region body
PF: predicated region fallthrough
CT: control target
= control target key end

     0   :  { %s1035_s0 = inlined_call_operand.vmem [shape: f32[2,32], index: 0, kind: input, shape index: {}]   ;;  %s1036_s1 = inlined_call_operand.vmem [shape: f32[2,32], index: 1, kind: input, shape index: {}]   ;;  %s1037_s2 = inlined_call_operand.vmem [shape: bf16[2,8,32], index: 2, kind: input, shape index: {}]   ;;  %s1038_s3 = inlined_call_operand.vmem [shape: bf16[32,32], index: 3, kind: input, shape index: {}]   ;;  %s1039_s4 = inlined_call_operand.vmem [shape: bf16[32,32], index: 4, kind: input, shape index: {}]   ;;  %s1040_s5 = inlined_call_operand.vmem [shape: f32[1,32], index: 5, kind: input, shape index: {}]   ;;  %s1041_s6 = inlined_call_operand.vmem [shape: f32[1,32], index: 6, kind: input, shape index: {}]   ;;  %s1042_s7 = inlined_call_operand.vmem [shape: bf16[32,96], index: 7, kind: input, shape index: {}]   ;;  %s1043_s8 = inlined_call_operand.vmem [shape: bf16[32,96], index: 8, kind: input, shape index: {}]   ;;  %s1044_s9 = inlined_call_operand.vmem [shape: f32[1,96], index: 9, kind: input, shape index: {}]   ;;  %s1045_s10 = inlined_call_operand.vmem [shape: bf16[32,96], index: 10, kind: input, shape index: {}]   ;;  %s1046_s11 = inlined_call_operand.vmem [shape: f32[1,96], index: 11, kind: input, shape index: {}]   ;;  %s1047_s12 = inlined_call_operand.vmem [shape: bf16[32,128], index: 12, kind: input, shape index: {}]   ;;  %s1048_s13 = inlined_call_operand.vmem [shape: bf16[32,128], index: 13, kind: input, shape index: {}]   ;;  %s1049_s14 = inlined_call_operand.hbm [shape: bf16[32,128], index: 14, kind: input, shape index: {}]   ;;  %s1050_s15 = inlined_call_operand.vmem [shape: f32[1,128], index: 15, kind: input, shape index: {}]   ;;  %s1051_s16 = inlined_call_operand.hbm [shape: f32[2,128], index: 16, kind: output, shape index: {0}]   ;;  %s1052_s17 = inlined_call_operand.hbm [shape: f32[2,32], index: 17, kind: output, shape index: {1}]  }
   0x1   :  { %1053 = sst [smem:[#allocation14_spill]] %s1035_s0 }
   0x2   :  { %1054 = sst [smem:[#allocation15_spill]] %s1036_s1 }
   0x3   :  { %23 = vsyncpa [#allocation6], 0 }
   0x4   :  { %24 = vsyncpa [#allocation7], 0 }
   0x5   :  { %25 = vsyncpa [#allocation10], 0  ;;  %s58_s26 = sshll.u32 %s1049_s14, 4  ;;  %s818_s27 = smov [#allocation5]   ;;  %s59_s26 = int_to_ptr.hbm [resolvable:$true] %s58_s26 }
   0x6   :  { %s60_s28 = sshll.u32 %s818_s27, 4  ;;  %s819_s29 = smov 64   ;;  %s61_s28 = int_to_ptr.vmem [resolvable:$true] %s60_s28 }
   0x7   :  { %s820_s0 = smov 4  }
   0x8   :  { %66 = dma.hbm_to_vmem [thread:$0]  %s59_s26, 256, %s61_s28, [#allocation6], %s819_s29, %s819_s29, %s820_s0  }
   0x9   :  { %812 = dma.done.wait [#allocation6], 256  }
   0xa   :  { %813 = vsyncadd [#allocation6], 4294967040  ;;  %v685_v0 = vld [vmem:[%s1038_s3 + $0x8] sm:$0xff]  ;;  %v684_v2 = vld [vmem:[%s1038_s3] sm:$0xff]  ;;  %s1055_s25 = sld [smem:[#allocation15_spill]]  ;;  %vm100_vm0 = vcmask 261120   ;;  %v185_v27 = vlaneseq }
   0xb   :  { %v687_v1 = vld [vmem:[%s1039_s4 + $0x8] sm:$0xff]  ;;  %v686_v3 = vld [vmem:[%s1039_s4] sm:$0xff]  ;;  %110 = vmatpush.bf16.msra.mxu0 %v685_v0  ;;  %vm189_vm1 = vcmask 1041409   ;;  %vm192_vm2 = vcmask 58368   ;;  %v821_v34 = vmov 0   ;;  %s822_s19 = smov 32  }
   0xc   :  { %147 = vmatpush.bf16.msra.mxu1 %v687_v1  ;;  %v683_v6 = vld [vmem:[%s1037_s2] sm:$0xff]  ;;  %v186_v28 = vand.u32 127, %v185_v27  ;;  %709 = vset.pattern.permute.xlu2 %v821_v34  ;;  %v693_v50 = vld [vmem:[%s1045_s10 + $0x8] sm:$0xff]  ;;  %s1056_s23 = sld [smem:[#allocation14_spill]]  ;;  %vm429_vm3 = vcmask 253952   ;;  %vm421_vm4 = vcmask 1040384  }
   0xd   :  { %v711_v10 = vld [vmem:[%s1040_s5] ss:$0 sm:$0xff]  ;;  %708 = vset.pattern.permute.xlu1 %v821_v34  ;;  %710 = vset.pattern.permute.xlu0 %v821_v34  ;;  %v689_v58 = vld [vmem:[%s1042_s7 + $0x8] sm:$0xff]  ;;  %vm415_vm9 = vcmask 254976   ;;  %s591_s20 = sshll.u32 %s1052_s17, 4  ;;  %s825_s22 = smov [#allocation8]   ;;  %s592_s20 = int_to_ptr.hbm [resolvable:$true] %s591_s20 }
   0xe   :  { %v712_v18 = vld [vmem:[%s1041_s6] ss:$0 sm:$0xff]  ;;  %323 = vmatpush.bf16.msra.mxu3 %v689_v58  ;;  %v691_v62 = vld [vmem:[%s1043_s8 + $0x8] sm:$0xff]  ;;  %s580_s26 = sshll.u32 %s1051_s16, 4  ;;  %s581_s26 = int_to_ptr.hbm [resolvable:$true] %s580_s26 }
   0xf   :  { %111 = vmatpush.bf16.msra.mxu0 %v684_v2  ;;  %v692_v51 = vld [vmem:[%s1045_s10] sm:$0xff]  ;;  %295 = vmatpush.bf16.msra.mxu2 %v691_v62 }
  0x10   :  { %v936_v4 = vld [vmem:[%s1055_s25] sm:$0x3]  ;;  %148 = vmatpush.bf16.msra.mxu1 %v686_v3 }
  0x11   :  { %v940_v5 = vpack.c.bf16 %v936_v4, %v936_v4  ;;  %v688_v59 = vld [vmem:[%s1042_s7] sm:$0xff] }
  0x12   :  { %324 = vmatpush.bf16.msra.mxu3 %v688_v59  ;;  %v78_v60 = vld [vmem:[%s1056_s23] sm:$0x3]  ;;  %s578_s23 = sshll.u32 %s825_s22, 4  ;;  %s579_s23 = int_to_ptr.vmem [resolvable:$true] %s578_s23 }
  0x13   :  { %614 = vmatmul.msk.bf16.vlgmr.msra.gmra.mxu0 %vm100_vm0, %v940_v5  ;;  %627 = vmatmul.msk.bf16.vlgmr.msra.gmra.mxu1 %vm100_vm0, %v683_v6  ;;  %v82_v61 = vpack.c.bf16 %v78_v60, %v78_v60  ;;  %v690_v63 = vld [vmem:[%s1043_s8] sm:$0xff] }
  0x14   :  { %361 = vmatpush.bf16.msrb.mxu0 %v693_v50  ;;  %296 = vmatpush.bf16.msra.mxu2 %v690_v63  ;;  %v81_v0 = vld [vmem:[%s1037_s2] sm:$0xff]  }
  0x15   :  { %645 = vmatmul.msk.bf16.vlgmr.msra.gmra.mxu3 %vm100_vm0, %v82_v61  ;;  %v231_v1 = vunpack.c.h.bf16 %v81_v0  ;;  %v230_v2 = vunpack.c.l.bf16 %v81_v0 }
  0x18   :  { %362 = vmatpush.bf16.msrb.mxu0 %v692_v51 }
  0x23   :  { %654 = vmatmul.msk.bf16.vlgmr.msrb.gmra.mxu0 %vm100_vm0, %v940_v5 }
  0x90   :  { %v113_v7 = vpop.f32.mrf.mxu0  ;;  %v150_v8 = vpop.f32.mrf.mxu1 }
  0x91   :  { %v157_v9 = vperm.slane %v113_v7, 0  ;;  %v156_v11 = vrot.slane %v113_v7, 1 }
  0x93   :  { %v161_v12 = vadd.f32 %v157_v9, %v150_v8  ;;  %v158_v14 = vperm.slane %v156_v11, 0 }
  0x95   :  { %v167_v13 = vadd.f32 %v711_v10, %v161_v12 }
  0x97   :  { %716 = vtanh.f32 %v167_v13 }
  0x98   :  { %v115_v15 = vpop.f32.mrf.mxu0  ;;  %v152_v16 = vpop.f32.mrf.mxu1 }
  0x99   :  { %v162_v17 = vadd.f32 %v158_v14, %v152_v16 }
  0x9b   :  { %v168_v19 = vadd.f32 %v711_v10, %v162_v17 }
  0x9d   :  { %v717_v20 = vpop.eup %716  ;;  %718 = vtanh.f32 %v168_v19 }
  0x9e   :  { %v175_v21 = vmul.f32 %v717_v20, %v712_v18 }
  0xa0   :  { %v177_v22 = vsel %vm100_vm0, %v175_v21, 0.0  ;;  %v697_v21 = vld [vmem:[%s1048_s13 + $0x8] sm:$0xff] }
  0xa1   :  { %178 = vadd.xlane.f32.xlu0 %v177_v22  ;;  %498 = vmatpush.bf16.msrb.mxu1 %v697_v21 }
  0xa3   :  { %v719_v23 = vpop.eup %718 }
  0xa4   :  { %v176_v24 = vmul.f32 %v719_v23, %v712_v18 }
  0xa6   :  { %v180_v25 = vsel %vm100_vm0, %v176_v24, 0.0  ;;  %v696_v24 = vld [vmem:[%s1048_s13] sm:$0xff] }
  0xa7   :  { %499 = vmatpush.bf16.msrb.mxu1 %v696_v24 }
  0xa9   :  { %181 = vadd.xlane.f32.xlu0 %v180_v25 }
 0x114   :  { %v179_v26 = vpop.xlane.xlu0 %178 }
 0x115   :  { %v187_v30 = vperm.slane %v179_v26, %v186_v28 }
 0x11c   :  { %v182_v29 = vpop.xlane.xlu0 %181 }
 0x11d   :  { %v188_v31 = vperm.slane %v182_v29, %v186_v28 }
 0x11f   :  { %v190_v32 = vsel %vm189_vm1, %v188_v31, %v187_v30 }
 0x120   :  { %v193_v33 = vsel %vm192_vm2, %v190_v32, -inf  ;;  %v713_v32 = vld [vmem:[%s1046_s11] ss:$0 sm:$0xff] }
 0x121   :  { %194 = vmax.xlane.f32.xlu1 %v193_v33  ;;  %v364_v33 = vpop.f32.mrf.mxu0 }
 0x194   :  { %v195_v35 = vpop.xlane.xlu1 %194 }
 0x195   :  { %v197_v36 = vperm.slane %v195_v35, 0  ;;  %v198_v37 = vperm.slane %v195_v35, 1 }
 0x197   :  { %v201_v38 = vsub.f32 %v179_v26, %v197_v36  ;;  %v202_v39 = vsub.f32 %v182_v29, %v198_v37  ;;  %v365_v37 = vadd.f32 %v713_v32, %v364_v33 }
 0x199   :  { %v203_v40 = vmul.f32 1.442695, %v201_v38  ;;  %v205_v41 = vmul.f32 1.442695, %v202_v39 }
 0x19b   :  { %720 = vpow2.f32 %v203_v40 }
 0x19c   :  { %722 = vpow2.f32 %v205_v41 }
 0x1a1   :  { %v721_v42 = vpop.eup %720 }
 0x1a2   :  { %v723_v43 = vpop.eup %722  ;;  %210 = vperm.xlu1 %708, %v721_v42  }
 0x1a3   :  { %213 = vperm.xlu2 %709, %v723_v43  }
 0x1fd   :  { %v214_v44 = vpop.permute.xlu2 %213 }
 0x1fe   :  { %v216_v46 = vperm.slane %v214_v44, %v186_v28 }
 0x214   :  { %v211_v45 = vpop.permute.xlu1 %210 }
 0x215   :  { %v215_v47 = vperm.slane %v211_v45, %v186_v28 }
 0x217   :  { %v217_v48 = vsel %vm189_vm1, %v216_v46, %v215_v47 }
 0x218   :  { %v219_v49 = vsel %vm192_vm2, %v217_v48, 0.0 }
 0x219   :  { %220 = vadd.xlane.f32.xlu2 %v219_v49 }
 0x28c   :  { %v221_v52 = vpop.xlane.xlu2 %220 }
 0x28d   :  { %724 = vrcp.f32 %v221_v52 }
 0x28e   :  { %726 = vtanh.f32 %v78_v60 }
 0x293   :  { %v725_v53 = vpop.eup %724 }
 0x294   :  { %v225_v54 = vperm.slane %v725_v53, 1  ;;  %v224_v55 = vperm.slane %v725_v53, 0  ;;  %v727_v27 = vpop.eup %726  ;;  %v326_v53 = vpop.f32.mrf.mxu3 }
 0x295   :  { %v464_v29 = vpack.c.bf16 %v727_v27, %v727_v27  ;;  %v695_v27 = vld [vmem:[%s1047_s12 + $0x8] sm:$0xff] }
 0x296   :  { %v229_v56 = vmul.f32 %v723_v43, %v225_v54  ;;  %v228_v57 = vmul.f32 %v721_v42, %v224_v55  ;;  %v366_v42 = vpop.f32.mrf.mxu0  ;;  %v714_v55 = vld [vmem:[%s1044_s9] ss:$0 sm:$0xff]  ;;  %s823_s9 = smov 96   ;;  %526 = vmatpush.bf16.msrb.mxu2 %v695_v27 }
 0x297   :  { %465 = vst.msk [vmem:[#allocation4] sm:$0x1] %vm429_vm3, %v464_v29  ;;  %v698_v29 = vld [vmem:[#allocation5] sm:$0xff] }
 0x298   :  { %239 = vperm.xlu1 %708, %v229_v56   ;;  %234 = vperm.xlu0 %710, %v228_v57  }
 0x29c   :  { %v328_v54 = vpop.f32.mrf.mxu3 }
 0x2a0   :  { %406 = vrot.lane.b32.xlu0 %v936_v4, %s822_s19  ;;  %389 = vrot.lane.b32.xlu1 %v365_v37, %s819_s29  ;;  %s824_s19 = smov [#allocation9]  }
 0x2a1   :  { %s589_s1 = sshll.u32 %s824_s19, 4  ;;  %s590_s1 = int_to_ptr.vmem [resolvable:$true] %s589_s1 }
 0x30a   :  { %v240_v3 = vpop.permute.xlu1 %239  ;;  %v235_v4 = vpop.permute.xlu0 %234 }
 0x30b   :  { %v243_v5 = vmul.f32 %v240_v3, %v231_v1  ;;  %v242_v6 = vmul.f32 %v235_v4, %v230_v2 }
 0x30d   :  { %v251_v7 = vsel %vm100_vm0, %v243_v5, 0.0  ;;  %v244_v8 = vsel %vm100_vm0, %v242_v6, 0.0 }
 0x30e   :  { %v252_v9 = vrot.slane %v251_v7, 4  ;;  %v245_v10 = vrot.slane %v244_v8, 4 }
 0x310   :  { %v253_v11 = vadd.f32 %v252_v9, %v251_v7  ;;  %v246_v12 = vadd.f32 %v245_v10, %v244_v8 }
 0x312   :  { %v254_v13 = vrot.slane %v253_v11, 2  ;;  %v247_v14 = vrot.slane %v246_v12, 2  ;;  %v390_v9 = vpop.permute.xlu1 %389 }
 0x314   :  { %v255_v15 = vadd.f32 %v254_v13, %v253_v11  ;;  %v248_v16 = vadd.f32 %v247_v14, %v246_v12 }
 0x316   :  { %v256_v17 = vrot.slane %v255_v15, 1  ;;  %v249_v18 = vrot.slane %v248_v16, 1 }
 0x318   :  { %v257_v19 = vadd.f32 %v256_v17, %v255_v15  ;;  %v250_v20 = vadd.f32 %v249_v18, %v248_v16  ;;  %v407_v17 = vpop.permute.xlu0 %406 }
 0x31a   :  { %728 = vtanh.f32 %v257_v19  ;;  %v258_v22 = vpack.c.bf16 %v250_v20, %v250_v20  ;;  %v259_v23 = vpack.c.bf16 %v257_v19, %v257_v19 }
 0x31b   :  { %730 = vtanh.f32 %v250_v20 }
 0x31c   :  { %v270_v25 = vunpack.c.l.b16 %v258_v22  ;;  %v271_v26 = vunpack.c.l.b16 %v259_v23 }
 0x31e   :  { %v272_v28 = vsel %vm189_vm1, %v271_v26, %v270_v25 }
 0x31f   :  { %v273_v30 = vpack.c.b16 %v272_v28, %v272_v28  ;;  %v699_v28 = vld [vmem:[#allocation5 + $0x8] sm:$0xff] }
 0x320   :  { %v729_v31 = vpop.eup %728  ;;  %559 = vmatpush.bf16.msrb.mxu3 %v699_v28 }
 0x321   :  { %v731_v34 = vpop.eup %730  ;;  %v434_v35 = vpack.c.bf16 %v729_v31, %v729_v31  ;;  %636 = vmatmul.msk.bf16.vlgmr.msra.gmra.mxu2 %vm100_vm0, %v273_v30  ;;  %v694_v30 = vld [vmem:[%s1047_s12] sm:$0xff]  ;;  %v533_v31 = vld [vmem:[#allocation4] sm:$0x1] }
 0x322   :  { %v433_v36 = vpack.c.bf16 %v731_v34, %v731_v34  ;;  %527 = vmatpush.bf16.msrb.mxu2 %v694_v30 }
 0x323   :  { %v438_v38 = vrot.slane %v434_v35, 3 }
 0x324   :  { %v437_v39 = vrot.slane %v433_v36, 3  ;;  %560 = vmatpush.bf16.msrb.mxu3 %v698_v29 }
 0x325   :  { %v444_v40 = vsel %vm421_vm4, %v434_v35, %v438_v38 }
 0x326   :  { %449 = vst [vmem:[#allocation1 + $0x20] ss:$4 sm:$0xff] %v444_v40  ;;  %v441_v41 = vsel %vm421_vm4, %v433_v36, %v437_v39  ;;  %v715_v39 = vld [vmem:[%s1050_s15] ss:$0 sm:$0xff] }
 0x327   :  { %445 = vst [vmem:[#allocation1] ss:$4 sm:$0xff] %v441_v41  ;;  %682 = vmatmul.msk.bf16.vlgmr.msrb.gmra.mxu3 %vm100_vm0, %v533_v31 }
 0x32d   :  { %v450_v43 = vld [vmem:[#allocation1 + $0x20] sm:$0xf] }
 0x32e   :  { %v446_v44 = vld [vmem:[#allocation1] sm:$0xf]  ;;  %v453_v45 = vunpack.c.l.b16 %v450_v43 }
 0x32f   :  { %v452_v46 = vunpack.c.l.b16 %v446_v44 }
 0x330   :  { %v454_v47 = vrot.slane %v453_v45, 7 }
 0x332   :  { %v455_v48 = vsel %vm189_vm1, %v454_v47, %v452_v46 }
 0x333   :  { %v456_v49 = vpack.c.b16 %v455_v48, %v455_v48 }
 0x335   :  { %v457_v50 = vrot.slane %v456_v49, 3 }
 0x337   :  { %v460_v51 = vsel %vm421_vm4, %v456_v49, %v457_v50 }
 0x338   :  { %462 = vst.msk [vmem:[#allocation3] sm:$0x1] %vm429_vm3, %v460_v51 }
 0x33f   :  { %v471_v52 = vld [vmem:[#allocation3] sm:$0x1] }
 0x340   :  { %664 = vmatmul.msk.bf16.vlgmr.msrb.gmra.mxu1 %vm100_vm0, %v471_v52 }
 0x3a4   :  { %v298_v56 = vpop.f32.mrf.mxu2 }
 0x3a5   :  { %v327_v57 = vadd.f32 %v326_v53, %v298_v56 }
 0x3a7   :  { %v334_v58 = vadd.f32 %v714_v55, %v327_v57 }
 0x3a9   :  { %v368_v59 = vadd.f32 %v365_v37, %v334_v58 }
 0x3aa   :  { %v562_v35 = vpop.f32.mrf.mxu3 }
 0x3ab   :  { %v655_v60 = vmul.f32 -1.442695, %v368_v59 }
 0x3ac   :  { %v300_v61 = vpop.f32.mrf.mxu2 }
 0x3ad   :  { %732 = vpow2.f32 %v655_v60 }
 0x3b2   :  { %v564_v36 = vpop.f32.mrf.mxu3 }
 0x3b3   :  { %v733_v62 = vpop.eup %732 }
 0x3b4   :  { %v372_v63 = vadd.f32 1.0, %v733_v62 }
 0x3b6   :  { %734 = vrcp.f32 %v372_v63  ;;  %v384_v4 = vand.u32 2147483648, %v372_v63  ;;  %v382_v6 = vand.u32 2147483647, %v372_v63  ;;  %vm378_vm6 = vweird.f32 %v372_v63 }
 0x3b8   :  { %v385_v8 = vor.u32 1.1754944e-38, %v384_v4  ;;  %vm383_vm8 = vcmp.eq.f32.partialorder %v382_v6, 8.507059e+37 }
 0x3bc   :  { %v735_v0 = vpop.eup %734 }
 0x3bd   :  { %v1012_v1 = vpop.f32.mrf.mxu1  ;;  %v374_v2 = vmul.f32 %v735_v0, %v372_v63  ;;  %vm379_vm5 = vweird.f32 %v735_v0 }
 0x3be   :  { %vm380_vm7 = vmor %vm378_vm6, %vm379_vm5 }
 0x3bf   :  { %v375_v3 = vsub.f32 1.0, %v374_v2 }
 0x3c1   :  { %v376_v5 = vmul.f32 %v735_v0, %v375_v3 }
 0x3c3   :  { %v377_v7 = vadd.f32 %v735_v0, %v376_v5 }
 0x3c5   :  { %v503_v10 = vpop.f32.mrf.mxu1  ;;  %v381_v11 = vsel %vm380_vm7, %v735_v0, %v377_v7 }
 0x3c6   :  { %v386_v12 = vsel %vm383_vm8, %v385_v8, %v381_v11 }
 0x3c7   :  { %v392_v13 = vmul.f32 %v390_v9, %v386_v12  ;;  %v399_v18 = vsub.f32 1.0, %v386_v12  ;;  %v409_v20 = vmul.f32 %v407_v17, %v386_v12 }
 0x3c9   :  { %394 = vrot.lane.b32.xlu1 %v392_v13, %s819_s29 }
 0x43b   :  { %v395_v14 = vpop.permute.xlu1 %394 }
 0x43c   :  { %v397_v15 = vadd.f32 %v395_v14, %v334_v58 }
 0x43e   :  { %736 = vtanh.f32 %v397_v15 }
 0x444   :  { %v737_v16 = vpop.eup %736 }
 0x445   :  { %401 = vrot.lane.b32.xlu2 %v737_v16, %s823_s9 }
 0x49f   :  { %v402_v19 = vpop.permute.xlu2 %401 }
 0x4a0   :  { %v404_v21 = vmul.f32 %v402_v19, %v399_v18 }
 0x4a2   :  { %v410_v22 = vadd.f32 %v409_v20, %v404_v21 }
 0x4a4   :  { %738 = vtanh.f32 %v410_v22  ;;  %412 = vrot.lane.b32.xlu0 %v410_v22, %s823_s9 }
 0x4aa   :  { %v739_v23 = vpop.eup %738 }
 0x4ab   :  { %v418_v24 = vpack.c.bf16 %v739_v23, %v739_v23 }
 0x4ad   :  { %v420_v25 = vrot.slane %v418_v24, 3 }
 0x4af   :  { %v424_v26 = vsel %vm421_vm4, %v418_v24, %v420_v25 }
 0x4b0   :  { %426 = vrot.lane.b32.xlu1 %v424_v26, %s823_s9 }
 0x516   :  { %v413_v32 = vpop.permute.xlu0 %412 }
 0x517   :  { %416 = vst.msk [vmem:[#allocation9] sm:$0x3] %vm415_vm9, %v413_v32 }
 0x518   :  { %594 = dma.vmem_to_hbm [thread:$0]  %s590_s1, 32, %s592_s20, [#allocation10]  }
 0x522   :  { %v427_v33 = vpop.permute.xlu1 %426 }
 0x523   :  { %430 = vst.msk [vmem:[#allocation2] sm:$0x1] %vm429_vm3, %v427_v33 }
 0x52a   :  { %v466_v34 = vld [vmem:[#allocation2] sm:$0x1] }
 0x52b   :  { %673 = vmatmul.msk.bf16.vlgmr.msrb.gmra.mxu2 %vm100_vm0, %v466_v34 }
 0x5ae   :  { %v529_v37 = vpop.f32.mrf.mxu2 }
 0x5af   :  { %v530_v38 = vadd.f32 %v529_v37, %v1012_v1 }
 0x5b1   :  { %v566_v40 = vadd.f32 %v562_v35, %v530_v38 }
 0x5b3   :  { %v571_v41 = vadd.f32 %v715_v39, %v566_v40 }
 0x5b5   :  { %572 = vst [vmem:[#allocation8] sm:$0x3] %v571_v41 }
 0x5b6   :  { %v531_v42 = vpop.f32.mrf.mxu2  ;;  %583 = dma.vmem_to_hbm [thread:$0]  %s579_s23, 32, %s581_s26, [#allocation7]  }
 0x5b7   :  { %814 = dma.done.wait [#allocation7], 32  }
 0x5b8   :  { %815 = vsyncadd [#allocation7], 4294967264 }
 0x5b9   :  { %816 = dma.done.wait [#allocation10], 32  }
 0x5ba   :  { %817 = vsyncadd [#allocation10], 4294967264 }
 0x5bb   :  { %603 = vsyncpa [#allocation6], 1 }
 0x5bc   :  { %604 = vsyncpa [#allocation7], 1 }
 0x5bd   :  { %605 = vsyncpa [#allocation10], 1 }

</bundles_post_ra>
